<compile_context>
chip_gen: v5e
topology: v5e:2x2
jax: 0.10.0
libtpu: 0.0.40
codegen_flags: <defaults>
</compile_context>

<pallas_src>
import functools
import math

import jax
import jax.numpy as jnp
from jax.experimental import pallas as pl
from jax.experimental.pallas import tpu as pltpu

# ----------------------------------------------------------------------------
# Scaled-down BertConfig (same structure as transformers.BertConfig).
# ----------------------------------------------------------------------------
VOCAB_SIZE   = 100
HIDDEN       = 32
NUM_LAYERS   = 2
NUM_HEADS    = 4
HEAD_DIM     = HIDDEN // NUM_HEADS
INTERMEDIATE = 64
MAX_POS      = 64
TYPE_VOCAB   = 2
LN_EPS       = 1e-12

LANE = 128
_SQRT1_2 = 0.7071067811865476


# ----------------------------------------------------------------------------
# In-kernel helpers (operate on values, not refs)
# ----------------------------------------------------------------------------
def _layer_norm(y, gamma, beta):
    """LayerNorm over the last axis (biased variance, matches nn.LayerNorm)."""
    mu = jnp.mean(y, axis=-1, keepdims=True)
    var = jnp.mean(jnp.square(y - mu), axis=-1, keepdims=True)
    return (y - mu) * jax.lax.rsqrt(var + LN_EPS) * gamma + beta


def _erf(x):
    # Abramowitz & Stegun 7.1.26 (max abs err ~1.5e-7): exact-GELU semantics of
    # HF hidden_act="gelu" using VPU FMAs + EUP exp + EUP reciprocal.
    a1, a2, a3, a4, a5 = (0.254829592, -0.284496736, 1.421413741,
                          -1.453152027, 1.061405429)
    p = 0.3275911
    sgn = jnp.where(x >= 0.0, 1.0, -1.0)
    ax = jnp.abs(x)
    t = pl.reciprocal(1.0 + p * ax)                    # EUP slot, exact
    poly = ((((a5 * t + a4) * t + a3) * t + a2) * t + a1) * t
    return sgn * (1.0 - poly * jnp.exp(-ax * ax))


def _gelu_exact(x):
    return 0.5 * x * (1.0 + _erf(x * _SQRT1_2))


# ----------------------------------------------------------------------------
# Fused kernel.  grid = (B, NUM_LAYERS); one program = one layer of one
# sequence.  Hidden state lives in a VMEM scratch across the layer axis.
# ----------------------------------------------------------------------------
def _bert_kernel(emb_ref, embln_ref, lp_ref,
                 qkv_w_ref, ao_w_ref, i_w_ref, o_w_ref,
                 out_ref, h_ref, *, seq):
    l = pl.program_id(1)
    n_layers = pl.num_programs(1)
    scale = 1.0 / math.sqrt(HEAD_DIM)

    # ---- embeddings LayerNorm (word+pos+type summed in the wrapper) --------
    @pl.when(l == 0)
    def _():
        g = embln_ref[0:1, :HIDDEN]
        b = embln_ref[1:2, :HIDDEN]
        h_ref[...] = _layer_norm(emb_ref[...], g, b)

    # ---- per-layer packed f32 params (one (8,128) slab) ---------------------
    lp = lp_ref[0]                                        # (8, 128) f32
    qkv_b = lp[0:1, :3 * HIDDEN]
    ao_b  = lp[1:2, :HIDDEN]
    ao_g  = lp[2:3, :HIDDEN]
    ao_bt = lp[3:4, :HIDDEN]
    i_b   = lp[4:5, :INTERMEDIATE]
    o_b   = lp[5:6, :HIDDEN]
    o_g   = lp[6:7, :HIDDEN]
    o_bt  = lp[7:8, :HIDDEN]

    # ---- per-head lane masks (VPU iota/compares, cheap) ---------------------
    col = jax.lax.broadcasted_iota(jnp.int32, (1, HIDDEN), 1)
    head_masks = [
        ((col >= hh * HEAD_DIM) & (col < (hh + 1) * HEAD_DIM)).astype(jnp.float32)
        for hh in range(NUM_HEADS)
    ]

    h = h_ref[...]                                        # (S, H) f32
    hb = h.astype(jnp.bfloat16)                           # cast once, reuse

    # ---- fused Q/K/V projection (bf16 MXU, f32 acc) --------------------------
    qkv = jnp.dot(hb, qkv_w_ref[0],
                  preferred_element_type=jnp.float32) + qkv_b     # (S, 3H)
    q = qkv[:, 0 * HIDDEN:1 * HIDDEN]
    k = qkv[:, 1 * HIDDEN:2 * HIDDEN]
    v = qkv[:, 2 * HIDDEN:3 * HIDDEN]

    # ---- self-attention: heads stacked on the sublane axis ------------------
    # Q_stacked[h*S:(h+1)*S] = q * head_mask_h  -> ONE score matmul, ONE
    # softmax, ONE P@V matmul for all heads of this sequence.
    q_stk = jnp.concatenate([q * hm for hm in head_masks],
                            axis=0).astype(jnp.bfloat16)          # (H*S, HIDDEN)
    kb = k.astype(jnp.bfloat16)
    vb = v.astype(jnp.bfloat16)

    s = jax.lax.dot_general(q_stk, kb, (((1,), (1,)), ((), ())),
                            preferred_element_type=jnp.float32) * scale  # (H*S, S)
    s = s - jnp.max(s, axis=-1, keepdims=True)
    pexp = jnp.exp(s)
    denom = jnp.sum(pexp, axis=-1, keepdims=True)
    pexp = pexp * pl.reciprocal(denom, approx=True)

    ctx_stk = jnp.dot(pexp.astype(jnp.bfloat16), vb,
                      preferred_element_type=jnp.float32)          # (H*S, HIDDEN)
    # (p_h @ v) * mask_h == p_h @ (v * mask_h): mask each head's row block and sum.
    ctx = ctx_stk[0:seq] * head_masks[0]
    for hh in range(1, NUM_HEADS):
        ctx = ctx + ctx_stk[hh * seq:(hh + 1) * seq] * head_masks[hh]

    # ---- attention output projection + residual + LayerNorm -----------------
    attn_out = jnp.dot(ctx.astype(jnp.bfloat16), ao_w_ref[0],
                       preferred_element_type=jnp.float32) + ao_b
    h = _layer_norm(attn_out + h, ao_g, ao_bt)
    hb = h.astype(jnp.bfloat16)

    # ---- feed-forward (exact GELU) + residual + LayerNorm --------------------
    inter = _gelu_exact(jnp.dot(hb, i_w_ref[0],
                                preferred_element_type=jnp.float32) + i_b)
    ffn_out = jnp.dot(inter.astype(jnp.bfloat16), o_w_ref[0],
                      preferred_element_type=jnp.float32) + o_b
    h = _layer_norm(ffn_out + h, o_g, o_bt)

    h_ref[...] = h

    # ---- lane-dense output store (padded to 128 lanes) ----------------------
    @pl.when(l == n_layers - 1)
    def _():
        pad = jnp.zeros((seq, LANE - HIDDEN), jnp.float32)
        out_ref[...] = jnp.concatenate([h, pad], axis=-1)


# ----------------------------------------------------------------------------
# Forward wrapper.
# ----------------------------------------------------------------------------
def bert_forward(params, x):
    B, S = x.shape
    # TODO(synk): the word-embedding gather is data-dependent indexing; kept as
    # plain-JAX glue (fused by XLA with the pos/type adds) rather than an
    # in-kernel DMA gather at this toy size.
    word = jnp.take(params["word_emb"], x.reshape(-1), axis=0)      # (B*S, H)
    pos = params["pos_emb"][:S]                                     # (S, H)
    typ = params["type_emb"][0]                                     # (H,)  token_type=0
    emb = (word.reshape(B, S, HIDDEN) + pos[None, :, :]
           + typ[None, None, :]).reshape(B * S, HIDDEN)

    # advisory cost estimate
    mm_flops = (2 * S * HIDDEN * 3 * HIDDEN
                + 2 * (NUM_HEADS * S) * HIDDEN * S
                + 2 * (NUM_HEADS * S) * S * HIDDEN
                + 2 * S * HIDDEN * HIDDEN
                + 2 * S * HIDDEN * INTERMEDIATE
                + 2 * S * INTERMEDIATE * HIDDEN)
    flops = B * NUM_LAYERS * mm_flops
    transcendentals = B * NUM_LAYERS * (NUM_HEADS * S * S + 2 * S * INTERMEDIATE)
    bytes_accessed = (B * S * HIDDEN * 4 + 8 * LANE * 4
                      + NUM_LAYERS * 8 * LANE * 4
                      + NUM_LAYERS * 2 * (HIDDEN * 3 * HIDDEN + HIDDEN * HIDDEN
                                          + HIDDEN * INTERMEDIATE
                                          + INTERMEDIATE * HIDDEN)
                      + B * S * LANE * 4)

    kernel = functools.partial(_bert_kernel, seq=S)
    grid_spec = pltpu.PrefetchScalarGridSpec(
        num_scalar_prefetch=0,
        grid=(B, NUM_LAYERS),
        in_specs=[
            pl.BlockSpec((S, HIDDEN), lambda b, l: (b, 0)),              # emb
            pl.BlockSpec((8, LANE), lambda b, l: (0, 0)),                # emb LN slab
            pl.BlockSpec((1, 8, LANE), lambda b, l: (l, 0, 0)),          # layer params
            pl.BlockSpec((1, HIDDEN, 3 * HIDDEN), lambda b, l: (l, 0, 0)),
            pl.BlockSpec((1, HIDDEN, HIDDEN), lambda b, l: (l, 0, 0)),
            pl.BlockSpec((1, HIDDEN, INTERMEDIATE), lambda b, l: (l, 0, 0)),
            pl.BlockSpec((1, INTERMEDIATE, HIDDEN), lambda b, l: (l, 0, 0)),
        ],
        out_specs=pl.BlockSpec((S, LANE), lambda b, l: (b, 0)),
        scratch_shapes=[pltpu.VMEM((S, HIDDEN), jnp.float32)],
    )

    out = pl.pallas_call(
        kernel,
        out_shape=jax.ShapeDtypeStruct((B * S, LANE), jnp.float32),
        grid_spec=grid_spec,
        compiler_params=pltpu.CompilerParams(
            dimension_semantics=("parallel", "arbitrary"),
            vmem_limit_bytes=32 * 1024 * 1024,
        ),
        cost_estimate=pl.CostEstimate(flops=flops,
                                      transcendentals=transcendentals,
                                      bytes_accessed=bytes_accessed),
    )(emb, params["emb_ln"], params["layer_params"],
      params["qkv_w"], params["ao_w"], params["i_w"], params["o_w"])

    return out[:, :HIDDEN].reshape(B, S, HIDDEN)


# ----------------------------------------------------------------------------
# Deterministic BERT-style init (N(0, 0.02) weights, zero biases, LN gamma=1 /
# beta=0), packed into the fused-kernel layout:
#   * q/k/v weights concatenated to (HIDDEN, 3*HIDDEN) per layer,
#   * per-layer matmul weights stacked on a leading layer axis, pre-cast bf16,
#   * all per-layer biases / LN params packed into one (L, 8, 128) f32 slab,
#   * embedding-LN params packed into one (8, 128) f32 slab.
# ----------------------------------------------------------------------------
def init_params(key):
    keys = iter(jax.random.split(key, 3 + NUM_LAYERS * 6))

    def normal(shape):
        return 0.02 * jax.random.normal(next(keys), shape, dtype=jnp.float32)

    def pad_row(v):
        row = jnp.zeros((LANE,), jnp.float32)
        return row.at[: v.shape[0]].set(v)

    qkv_w, ao_w, i_w, o_w, layer_rows = [], [], [], [], []
    for _ in range(NUM_LAYERS):
        qw, kw, vw = (normal((HIDDEN, HIDDEN)), normal((HIDDEN, HIDDEN)),
                      normal((HIDDEN, HIDDEN)))
        qkv_w.append(jnp.concatenate([qw, kw, vw], axis=1))          # (H, 3H)
        ao_w.append(normal((HIDDEN, HIDDEN)))
        i_w.append(normal((HIDDEN, INTERMEDIATE)))
        o_w.append(normal((INTERMEDIATE, HIDDEN)))
        rows = jnp.stack([
            pad_row(jnp.zeros((3 * HIDDEN,), jnp.float32)),          # qkv bias
            pad_row(jnp.zeros((HIDDEN,), jnp.float32)),              # attn out bias
            pad_row(jnp.ones((HIDDEN,), jnp.float32)),               # attn LN gamma
            pad_row(jnp.zeros((HIDDEN,), jnp.float32)),              # attn LN beta
            pad_row(jnp.zeros((INTERMEDIATE,), jnp.float32)),        # intermediate bias
            pad_row(jnp.zeros((HIDDEN,), jnp.float32)),              # output bias
            pad_row(jnp.ones((HIDDEN,), jnp.float32)),               # out LN gamma
            pad_row(jnp.zeros((HIDDEN,), jnp.float32)),              # out LN beta
        ])                                                           # (8, 128)
        layer_rows.append(rows)

    emb_ln = jnp.zeros((8, LANE), jnp.float32)
    emb_ln = emb_ln.at[0, :HIDDEN].set(1.0)                          # gamma
    # row 1 (beta) stays zero

    bf16 = jnp.bfloat16
    return {
        "word_emb": normal((VOCAB_SIZE, HIDDEN)),
        "pos_emb":  normal((MAX_POS, HIDDEN)),
        "type_emb": normal((TYPE_VOCAB, HIDDEN)),
        "emb_ln": emb_ln,
        "layer_params": jnp.stack(layer_rows),                       # (L, 8, 128)
        "qkv_w": jnp.stack(qkv_w).astype(bf16),                      # (L, H, 3H)
        "ao_w":  jnp.stack(ao_w).astype(bf16),                       # (L, H, H)
        "i_w":   jnp.stack(i_w).astype(bf16),                        # (L, H, I)
        "o_w":   jnp.stack(o_w).astype(bf16),                        # (L, I, H)
    }


if __name__ == "__main__":
    B, S = 2, 8
    root = jax.random.PRNGKey(0)
    k_x, k_p = jax.random.split(root)
    x = jax.random.randint(k_x, (B, S), 0, VOCAB_SIZE, dtype=jnp.int32)
    params = init_params(k_p)

    y = jax.block_until_ready(bert_forward(params, x))

    assert y.shape == (B, S, HIDDEN), y.shape
    assert y.dtype == jnp.float32
    assert bool(jnp.all(jnp.isfinite(y)))
    print("KERNEL_OK")
</pallas_src>

<mosaic_0001>
module attributes {stable_mosaic.version = 11 : i64} {
  func.func @_bert_kernel(%arg0: i32, %arg1: i32, %arg2: memref<8x32xf32, #tpu.memory_space<vmem>>, %arg3: memref<8x128xf32, #tpu.memory_space<vmem>>, %arg4: memref<1x8x128xf32, #tpu.memory_space<vmem>>, %arg5: memref<1x32x96xbf16, #tpu.memory_space<vmem>>, %arg6: memref<1x32x32xbf16, #tpu.memory_space<vmem>>, %arg7: memref<1x32x64xbf16, #tpu.memory_space<vmem>>, %arg8: memref<1x64x32xbf16, #tpu.memory_space<vmem>>, %arg9: memref<8x128xf32, #tpu.memory_space<vmem>>, %arg10: memref<8x32xf32, #tpu.memory_space<vmem>>) attributes {dimension_semantics = [#tpu.dimension_semantics<parallel>, #tpu.dimension_semantics<arbitrary>], iteration_bounds = array<i64: 2, 2>, scalar_prefetch = 0 : i64, scratch_operands = 1 : i64, tpu.core_type = #tpu.core_type<tc>, window_params = [{transform_indices = @transform_0, window_bounds = array<i64: 8, 32>}, {pipeline_mode = #tpu.pipeline_mode<synchronous>, transform_indices = @transform_1, window_bounds = array<i64: 8, 128>}, {transform_indices = @transform_2, window_bounds = array<i64: 1, 8, 128>}, {transform_indices = @transform_3, window_bounds = array<i64: 1, 32, 96>}, {transform_indices = @transform_4, window_bounds = array<i64: 1, 32, 32>}, {transform_indices = @transform_5, window_bounds = array<i64: 1, 32, 64>}, {transform_indices = @transform_6, window_bounds = array<i64: 1, 64, 32>}, {transform_indices = @transform_7, window_bounds = array<i64: 8, 128>}]} {
    %c0_i32 = arith.constant 0 : i32
    %0 = arith.cmpi eq, %arg1, %c0_i32 : i32
    %1 = arith.extui %0 : i1 to i32
    %c0_i32_0 = arith.constant 0 : i32
    %2 = arith.cmpi ne, %1, %c0_i32_0 : i32
    scf.if %2 {
      %c0_57 = arith.constant 0 : index
      %c0_58 = arith.constant 0 : index
      %202 = vector.load %arg3[%c0_57, %c0_58] : memref<8x128xf32, #tpu.memory_space<vmem>>, vector<1x32xf32>
      %c1 = arith.constant 1 : index
      %c0_59 = arith.constant 0 : index
      %203 = vector.load %arg3[%c1, %c0_59] : memref<8x128xf32, #tpu.memory_space<vmem>>, vector<1x32xf32>
      %c0_60 = arith.constant 0 : index
      %c0_61 = arith.constant 0 : index
      %204 = vector.load %arg2[%c0_60, %c0_61] : memref<8x32xf32, #tpu.memory_space<vmem>>, vector<8x32xf32>
      %cst_62 = arith.constant dense<0.000000e+00> : vector<8xf32>
      %205 = vector.multi_reduction <add>, %204, %cst_62 [1] : vector<8x32xf32> to vector<8xf32>
      %206 = vector.shape_cast %205 : vector<8xf32> to vector<8x1xf32>
      %cst_63 = arith.constant 3.200000e+01 : f32
      %207 = vector.broadcast %cst_63 : f32 to vector<8x1xf32>
      %208 = arith.divf %206, %207 : vector<8x1xf32>
      %209 = vector.broadcast %208 : vector<8x1xf32> to vector<8x32xf32>
      %210 = arith.subf %204, %209 : vector<8x32xf32>
      %211 = arith.mulf %210, %210 : vector<8x32xf32>
      %cst_64 = arith.constant dense<0.000000e+00> : vector<8xf32>
      %212 = vector.multi_reduction <add>, %211, %cst_64 [1] : vector<8x32xf32> to vector<8xf32>
      %213 = vector.shape_cast %212 : vector<8xf32> to vector<8x1xf32>
      %cst_65 = arith.constant 3.200000e+01 : f32
      %214 = vector.broadcast %cst_65 : f32 to vector<8x1xf32>
      %215 = arith.divf %213, %214 : vector<8x1xf32>
      %216 = vector.broadcast %208 : vector<8x1xf32> to vector<8x32xf32>
      %217 = arith.subf %204, %216 : vector<8x32xf32>
      %cst_66 = arith.constant 9.99999996E-13 : f32
      %218 = vector.broadcast %cst_66 : f32 to vector<8x1xf32>
      %219 = arith.addf %215, %218 : vector<8x1xf32>
      %220 = math.rsqrt %219 : vector<8x1xf32>
      %221 = vector.broadcast %220 : vector<8x1xf32> to vector<8x32xf32>
      %222 = arith.mulf %217, %221 : vector<8x32xf32>
      %223 = vector.broadcast %202 : vector<1x32xf32> to vector<8x32xf32>
      %224 = arith.mulf %222, %223 : vector<8x32xf32>
      %225 = vector.broadcast %203 : vector<1x32xf32> to vector<8x32xf32>
      %226 = arith.addf %224, %225 : vector<8x32xf32>
      %c0_67 = arith.constant 0 : index
      %c0_68 = arith.constant 0 : index
      %227 = vector.load %arg10[%c0_67, %c0_68] : memref<8x32xf32, #tpu.memory_space<vmem>>, vector<8x32xf32>
      tpu.vector_store %arg10[%c0_67, %c0_68], %226 {strides = array<i32>} : memref<8x32xf32, #tpu.memory_space<vmem>>, vector<8x32xf32>,
    } else {
    }
    %c0 = arith.constant 0 : index
    %c0_1 = arith.constant 0 : index
    %c0_2 = arith.constant 0 : index
    %3 = vector.load %arg4[%c0, %c0_1, %c0_2] : memref<1x8x128xf32, #tpu.memory_space<vmem>>, vector<1x8x128xf32>
    %4 = vector.shape_cast %3 : vector<1x8x128xf32> to vector<8x128xf32>
    %5 = vector.extract_strided_slice %4 {offsets = [0, 0], sizes = [1, 96], strides = [1, 1]} : vector<8x128xf32> to vector<1x96xf32>
    %6 = vector.extract_strided_slice %4 {offsets = [1, 0], sizes = [1, 32], strides = [1, 1]} : vector<8x128xf32> to vector<1x32xf32>
    %7 = vector.extract_strided_slice %4 {offsets = [2, 0], sizes = [1, 32], strides = [1, 1]} : vector<8x128xf32> to vector<1x32xf32>
    %8 = vector.extract_strided_slice %4 {offsets = [3, 0], sizes = [1, 32], strides = [1, 1]} : vector<8x128xf32> to vector<1x32xf32>
    %9 = vector.extract_strided_slice %4 {offsets = [4, 0], sizes = [1, 64], strides = [1, 1]} : vector<8x128xf32> to vector<1x64xf32>
    %10 = vector.extract_strided_slice %4 {offsets = [5, 0], sizes = [1, 32], strides = [1, 1]} : vector<8x128xf32> to vector<1x32xf32>
    %11 = vector.extract_strided_slice %4 {offsets = [6, 0], sizes = [1, 32], strides = [1, 1]} : vector<8x128xf32> to vector<1x32xf32>
    %12 = vector.extract_strided_slice %4 {offsets = [7, 0], sizes = [1, 32], strides = [1, 1]} : vector<8x128xf32> to vector<1x32xf32>
    %13 = tpu.iota {dimensions = array<i32: 1>} : vector<1x32xi32>
    %c0_i32_3 = arith.constant 0 : i32
    %14 = vector.broadcast %c0_i32_3 : i32 to vector<1x32xi32>
    %15 = arith.cmpi sge, %13, %14 : vector<1x32xi32>
    %c8_i32 = arith.constant 8 : i32
    %16 = vector.broadcast %c8_i32 : i32 to vector<1x32xi32>
    %17 = arith.cmpi slt, %13, %16 : vector<1x32xi32>
    %18 = arith.andi %15, %17 : vector<1x32xi1>
    %19 = arith.extui %18 : vector<1x32xi1> to vector<1x32xi32>
    %20 = arith.sitofp %19 : vector<1x32xi32> to vector<1x32xf32>
    %c8_i32_4 = arith.constant 8 : i32
    %21 = vector.broadcast %c8_i32_4 : i32 to vector<1x32xi32>
    %22 = arith.cmpi sge, %13, %21 : vector<1x32xi32>
    %c16_i32 = arith.constant 16 : i32
    %23 = vector.broadcast %c16_i32 : i32 to vector<1x32xi32>
    %24 = arith.cmpi slt, %13, %23 : vector<1x32xi32>
    %25 = arith.andi %22, %24 : vector<1x32xi1>
    %26 = arith.extui %25 : vector<1x32xi1> to vector<1x32xi32>
    %27 = arith.sitofp %26 : vector<1x32xi32> to vector<1x32xf32>
    %c16_i32_5 = arith.constant 16 : i32
    %28 = vector.broadcast %c16_i32_5 : i32 to vector<1x32xi32>
    %29 = arith.cmpi sge, %13, %28 : vector<1x32xi32>
    %c24_i32 = arith.constant 24 : i32
    %30 = vector.broadcast %c24_i32 : i32 to vector<1x32xi32>
    %31 = arith.cmpi slt, %13, %30 : vector<1x32xi32>
    %32 = arith.andi %29, %31 : vector<1x32xi1>
    %33 = arith.extui %32 : vector<1x32xi1> to vector<1x32xi32>
    %34 = arith.sitofp %33 : vector<1x32xi32> to vector<1x32xf32>
    %c24_i32_6 = arith.constant 24 : i32
    %35 = vector.broadcast %c24_i32_6 : i32 to vector<1x32xi32>
    %36 = arith.cmpi sge, %13, %35 : vector<1x32xi32>
    %c32_i32 = arith.constant 32 : i32
    %37 = vector.broadcast %c32_i32 : i32 to vector<1x32xi32>
    %38 = arith.cmpi slt, %13, %37 : vector<1x32xi32>
    %39 = arith.andi %36, %38 : vector<1x32xi1>
    %40 = arith.extui %39 : vector<1x32xi1> to vector<1x32xi32>
    %41 = arith.sitofp %40 : vector<1x32xi32> to vector<1x32xf32>
    %c0_7 = arith.constant 0 : index
    %c0_8 = arith.constant 0 : index
    %42 = vector.load %arg10[%c0_7, %c0_8] : memref<8x32xf32, #tpu.memory_space<vmem>>, vector<8x32xf32>
    %43 = arith.truncf %42 : vector<8x32xf32> to vector<8x32xbf16>
    %c0_9 = arith.constant 0 : index
    %c0_10 = arith.constant 0 : index
    %c0_11 = arith.constant 0 : index
    %44 = vector.load %arg5[%c0_9, %c0_10, %c0_11] : memref<1x32x96xbf16, #tpu.memory_space<vmem>>, vector<1x32x96xbf16>
    %45 = vector.shape_cast %44 : vector<1x32x96xbf16> to vector<32x96xbf16>
    %cst = arith.constant dense<0.000000e+00> : vector<8x96xf32>
    %46 = tpu.matmul %43, %45, %cst {dimension_numbers = #tpu.dot_dimension_numbers<[1], [0], [0], [1], [0, 0, 1, 1], [], []>} : vector<8x32xbf16>, vector<32x96xbf16>, vector<8x96xf32> -> vector<8x96xf32>
    %47 = vector.broadcast %5 : vector<1x96xf32> to vector<8x96xf32>
    %48 = arith.addf %46, %47 : vector<8x96xf32>
    %49 = vector.extract_strided_slice %48 {offsets = [0, 0], sizes = [8, 32], strides = [1, 1]} : vector<8x96xf32> to vector<8x32xf32>
    %50 = vector.extract_strided_slice %48 {offsets = [0, 32], sizes = [8, 32], strides = [1, 1]} : vector<8x96xf32> to vector<8x32xf32>
    %51 = vector.extract_strided_slice %48 {offsets = [0, 64], sizes = [8, 32], strides = [1, 1]} : vector<8x96xf32> to vector<8x32xf32>
    %52 = vector.broadcast %20 : vector<1x32xf32> to vector<8x32xf32>
    %53 = arith.mulf %49, %52 : vector<8x32xf32>
    %54 = vector.broadcast %27 : vector<1x32xf32> to vector<8x32xf32>
    %55 = arith.mulf %49, %54 : vector<8x32xf32>
    %56 = vector.broadcast %34 : vector<1x32xf32> to vector<8x32xf32>
    %57 = arith.mulf %49, %56 : vector<8x32xf32>
    %58 = vector.broadcast %41 : vector<1x32xf32> to vector<8x32xf32>
    %59 = arith.mulf %49, %58 : vector<8x32xf32>
    %60 = tpu.concatenate %53, %55, %57, %59 in 0 : vector<8x32xf32>, vector<8x32xf32>, vector<8x32xf32>, vector<8x32xf32> -> vector<32x32xf32>
    %61 = arith.truncf %60 : vector<32x32xf32> to vector<32x32xbf16>
    %62 = arith.truncf %50 : vector<8x32xf32> to vector<8x32xbf16>
    %63 = arith.truncf %51 : vector<8x32xf32> to vector<8x32xbf16>
    %cst_12 = arith.constant dense<0.000000e+00> : vector<32x8xf32>
    %64 = tpu.matmul %61, %62, %cst_12 {dimension_numbers = #tpu.dot_dimension_numbers<[1], [1], [0], [0], [0, 0, 1, 0], [], []>} : vector<32x32xbf16>, vector<8x32xbf16>, vector<32x8xf32> -> vector<32x8xf32>
    %cst_13 = arith.constant 0.353553385 : f32
    %65 = vector.broadcast %cst_13 : f32 to vector<32x8xf32>
    %66 = arith.mulf %64, %65 : vector<32x8xf32>
    %cst_14 = arith.constant dense<0xFF800000> : vector<32xf32>
    %67 = vector.multi_reduction <maximumf>, %66, %cst_14 [1] : vector<32x8xf32> to vector<32xf32>
    %68 = vector.shape_cast %67 : vector<32xf32> to vector<32x1xf32>
    %69 = vector.broadcast %68 : vector<32x1xf32> to vector<32x8xf32>
    %70 = arith.subf %66, %69 : vector<32x8xf32>
    %71 = math.exp %70 : vector<32x8xf32>
    %cst_15 = arith.constant dense<0.000000e+00> : vector<32xf32>
    %72 = vector.multi_reduction <add>, %71, %cst_15 [1] : vector<32x8xf32> to vector<32xf32>
    %73 = vector.shape_cast %72 : vector<32xf32> to vector<32x1xf32>
    %74 = tpu.reciprocal %73 {approx = true} : vector<32x1xf32> -> vector<32x1xf32>
    %75 = vector.broadcast %74 : vector<32x1xf32> to vector<32x8xf32>
    %76 = arith.mulf %71, %75 : vector<32x8xf32>
    %77 = arith.truncf %76 : vector<32x8xf32> to vector<32x8xbf16>
    %cst_16 = arith.constant dense<0.000000e+00> : vector<32x32xf32>
    %78 = tpu.matmul %77, %63, %cst_16 {dimension_numbers = #tpu.dot_dimension_numbers<[1], [0], [0], [1], [0, 0, 1, 1], [], []>} : vector<32x8xbf16>, vector<8x32xbf16>, vector<32x32xf32> -> vector<32x32xf32>
    %79 = vector.extract_strided_slice %78 {offsets = [0, 0], sizes = [8, 32], strides = [1, 1]} : vector<32x32xf32> to vector<8x32xf32>
    %80 = vector.broadcast %20 : vector<1x32xf32> to vector<8x32xf32>
    %81 = arith.mulf %79, %80 : vector<8x32xf32>
    %82 = vector.extract_strided_slice %78 {offsets = [8, 0], sizes = [8, 32], strides = [1, 1]} : vector<32x32xf32> to vector<8x32xf32>
    %83 = vector.broadcast %27 : vector<1x32xf32> to vector<8x32xf32>
    %84 = arith.mulf %82, %83 : vector<8x32xf32>
    %85 = arith.addf %81, %84 : vector<8x32xf32>
    %86 = vector.extract_strided_slice %78 {offsets = [16, 0], sizes = [8, 32], strides = [1, 1]} : vector<32x32xf32> to vector<8x32xf32>
    %87 = vector.broadcast %34 : vector<1x32xf32> to vector<8x32xf32>
    %88 = arith.mulf %86, %87 : vector<8x32xf32>
    %89 = arith.addf %85, %88 : vector<8x32xf32>
    %90 = vector.extract_strided_slice %78 {offsets = [24, 0], sizes = [8, 32], strides = [1, 1]} : vector<32x32xf32> to vector<8x32xf32>
    %91 = vector.broadcast %41 : vector<1x32xf32> to vector<8x32xf32>
    %92 = arith.mulf %90, %91 : vector<8x32xf32>
    %93 = arith.addf %89, %92 : vector<8x32xf32>
    %94 = arith.truncf %93 : vector<8x32xf32> to vector<8x32xbf16>
    %c0_17 = arith.constant 0 : index
    %c0_18 = arith.constant 0 : index
    %c0_19 = arith.constant 0 : index
    %95 = vector.load %arg6[%c0_17, %c0_18, %c0_19] : memref<1x32x32xbf16, #tpu.memory_space<vmem>>, vector<1x32x32xbf16>
    %96 = vector.shape_cast %95 : vector<1x32x32xbf16> to vector<32x32xbf16>
    %cst_20 = arith.constant dense<0.000000e+00> : vector<8x32xf32>
    %97 = tpu.matmul %94, %96, %cst_20 {dimension_numbers = #tpu.dot_dimension_numbers<[1], [0], [0], [1], [0, 0, 1, 1], [], []>} : vector<8x32xbf16>, vector<32x32xbf16>, vector<8x32xf32> -> vector<8x32xf32>
    %98 = vector.broadcast %6 : vector<1x32xf32> to vector<8x32xf32>
    %99 = arith.addf %97, %98 : vector<8x32xf32>
    %100 = arith.addf %99, %42 : vector<8x32xf32>
    %cst_21 = arith.constant dense<0.000000e+00> : vector<8xf32>
    %101 = vector.multi_reduction <add>, %100, %cst_21 [1] : vector<8x32xf32> to vector<8xf32>
    %102 = vector.shape_cast %101 : vector<8xf32> to vector<8x1xf32>
    %cst_22 = arith.constant 3.200000e+01 : f32
    %103 = vector.broadcast %cst_22 : f32 to vector<8x1xf32>
    %104 = arith.divf %102, %103 : vector<8x1xf32>
    %105 = vector.broadcast %104 : vector<8x1xf32> to vector<8x32xf32>
    %106 = arith.subf %100, %105 : vector<8x32xf32>
    %107 = arith.mulf %106, %106 : vector<8x32xf32>
    %cst_23 = arith.constant dense<0.000000e+00> : vector<8xf32>
    %108 = vector.multi_reduction <add>, %107, %cst_23 [1] : vector<8x32xf32> to vector<8xf32>
    %109 = vector.shape_cast %108 : vector<8xf32> to vector<8x1xf32>
    %cst_24 = arith.constant 3.200000e+01 : f32
    %110 = vector.broadcast %cst_24 : f32 to vector<8x1xf32>
    %111 = arith.divf %109, %110 : vector<8x1xf32>
    %112 = vector.broadcast %104 : vector<8x1xf32> to vector<8x32xf32>
    %113 = arith.subf %100, %112 : vector<8x32xf32>
    %cst_25 = arith.constant 9.99999996E-13 : f32
    %114 = vector.broadcast %cst_25 : f32 to vector<8x1xf32>
    %115 = arith.addf %111, %114 : vector<8x1xf32>
    %116 = math.rsqrt %115 : vector<8x1xf32>
    %117 = vector.broadcast %116 : vector<8x1xf32> to vector<8x32xf32>
    %118 = arith.mulf %113, %117 : vector<8x32xf32>
    %119 = vector.broadcast %7 : vector<1x32xf32> to vector<8x32xf32>
    %120 = arith.mulf %118, %119 : vector<8x32xf32>
    %121 = vector.broadcast %8 : vector<1x32xf32> to vector<8x32xf32>
    %122 = arith.addf %120, %121 : vector<8x32xf32>
    %123 = arith.truncf %122 : vector<8x32xf32> to vector<8x32xbf16>
    %c0_26 = arith.constant 0 : index
    %c0_27 = arith.constant 0 : index
    %c0_28 = arith.constant 0 : index
    %124 = vector.load %arg7[%c0_26, %c0_27, %c0_28] : memref<1x32x64xbf16, #tpu.memory_space<vmem>>, vector<1x32x64xbf16>
    %125 = vector.shape_cast %124 : vector<1x32x64xbf16> to vector<32x64xbf16>
    %cst_29 = arith.constant dense<0.000000e+00> : vector<8x64xf32>
    %126 = tpu.matmul %123, %125, %cst_29 {dimension_numbers = #tpu.dot_dimension_numbers<[1], [0], [0], [1], [0, 0, 1, 1], [], []>} : vector<8x32xbf16>, vector<32x64xbf16>, vector<8x64xf32> -> vector<8x64xf32>
    %127 = vector.broadcast %9 : vector<1x64xf32> to vector<8x64xf32>
    %128 = arith.addf %126, %127 : vector<8x64xf32>
    %cst_30 = arith.constant 5.000000e-01 : f32
    %129 = vector.broadcast %cst_30 : f32 to vector<8x64xf32>
    %130 = arith.mulf %129, %128 : vector<8x64xf32>
    %cst_31 = arith.constant 0.707106769 : f32
    %131 = vector.broadcast %cst_31 : f32 to vector<8x64xf32>
    %132 = arith.mulf %128, %131 : vector<8x64xf32>
    %cst_32 = arith.constant 0.000000e+00 : f32
    %133 = vector.broadcast %cst_32 : f32 to vector<8x64xf32>
    %134 = arith.cmpf oge, %132, %133 : vector<8x64xf32>
    %cst_33 = arith.constant 1.000000e+00 : f32
    %cst_34 = arith.constant -1.000000e+00 : f32
    %135 = vector.broadcast %cst_33 : f32 to vector<8x64xf32>
    %136 = vector.broadcast %cst_34 : f32 to vector<8x64xf32>
    %137 = arith.select %134, %135, %136 : vector<8x64xi1>, vector<8x64xf32>
    %138 = math.absf %132 : vector<8x64xf32>
    %cst_35 = arith.constant 0.327591091 : f32
    %139 = vector.broadcast %cst_35 : f32 to vector<8x64xf32>
    %140 = arith.mulf %139, %138 : vector<8x64xf32>
    %cst_36 = arith.constant 1.000000e+00 : f32
    %141 = vector.broadcast %cst_36 : f32 to vector<8x64xf32>
    %142 = arith.addf %141, %140 : vector<8x64xf32>
    %143 = tpu.reciprocal %142 : vector<8x64xf32> -> vector<8x64xf32>
    %cst_37 = arith.constant 1.06140542 : f32
    %144 = vector.broadcast %cst_37 : f32 to vector<8x64xf32>
    %145 = arith.mulf %144, %143 : vector<8x64xf32>
    %cst_38 = arith.constant -1.45315206 : f32
    %146 = vector.broadcast %cst_38 : f32 to vector<8x64xf32>
    %147 = arith.addf %145, %146 : vector<8x64xf32>
    %148 = arith.mulf %147, %143 : vector<8x64xf32>
    %cst_39 = arith.constant 1.42141378 : f32
    %149 = vector.broadcast %cst_39 : f32 to vector<8x64xf32>
    %150 = arith.addf %148, %149 : vector<8x64xf32>
    %151 = arith.mulf %150, %143 : vector<8x64xf32>
    %cst_40 = arith.constant -0.284496725 : f32
    %152 = vector.broadcast %cst_40 : f32 to vector<8x64xf32>
    %153 = arith.addf %151, %152 : vector<8x64xf32>
    %154 = arith.mulf %153, %143 : vector<8x64xf32>
    %cst_41 = arith.constant 0.254829586 : f32
    %155 = vector.broadcast %cst_41 : f32 to vector<8x64xf32>
    %156 = arith.addf %154, %155 : vector<8x64xf32>
    %157 = arith.mulf %156, %143 : vector<8x64xf32>
    %cst_42 = arith.constant 0.000000e+00 : f32
    %158 = vector.broadcast %cst_42 : f32 to vector<8x64xf32>
    %159 = arith.subf %158, %138 : vector<8x64xf32>
    %160 = arith.mulf %159, %138 : vector<8x64xf32>
    %161 = math.exp %160 : vector<8x64xf32>
    %162 = arith.mulf %157, %161 : vector<8x64xf32>
    %cst_43 = arith.constant 1.000000e+00 : f32
    %163 = vector.broadcast %cst_43 : f32 to vector<8x64xf32>
    %164 = arith.subf %163, %162 : vector<8x64xf32>
    %165 = arith.mulf %137, %164 : vector<8x64xf32>
    %cst_44 = arith.constant 1.000000e+00 : f32
    %166 = vector.broadcast %cst_44 : f32 to vector<8x64xf32>
    %167 = arith.addf %166, %165 : vector<8x64xf32>
    %168 = arith.mulf %130, %167 : vector<8x64xf32>
    %169 = arith.truncf %168 : vector<8x64xf32> to vector<8x64xbf16>
    %c0_45 = arith.constant 0 : index
    %c0_46 = arith.constant 0 : index
    %c0_47 = arith.constant 0 : index
    %170 = vector.load %arg8[%c0_45, %c0_46, %c0_47] : memref<1x64x32xbf16, #tpu.memory_space<vmem>>, vector<1x64x32xbf16>
    %171 = vector.shape_cast %170 : vector<1x64x32xbf16> to vector<64x32xbf16>
    %cst_48 = arith.constant dense<0.000000e+00> : vector<8x32xf32>
    %172 = tpu.matmul %169, %171, %cst_48 {dimension_numbers = #tpu.dot_dimension_numbers<[1], [0], [0], [1], [0, 0, 1, 1], [], []>} : vector<8x64xbf16>, vector<64x32xbf16>, vector<8x32xf32> -> vector<8x32xf32>
    %173 = vector.broadcast %10 : vector<1x32xf32> to vector<8x32xf32>
    %174 = arith.addf %172, %173 : vector<8x32xf32>
    %175 = arith.addf %174, %122 : vector<8x32xf32>
    %cst_49 = arith.constant dense<0.000000e+00> : vector<8xf32>
    %176 = vector.multi_reduction <add>, %175, %cst_49 [1] : vector<8x32xf32> to vector<8xf32>
    %177 = vector.shape_cast %176 : vector<8xf32> to vector<8x1xf32>
    %cst_50 = arith.constant 3.200000e+01 : f32
    %178 = vector.broadcast %cst_50 : f32 to vector<8x1xf32>
    %179 = arith.divf %177, %178 : vector<8x1xf32>
    %180 = vector.broadcast %179 : vector<8x1xf32> to vector<8x32xf32>
    %181 = arith.subf %175, %180 : vector<8x32xf32>
    %182 = arith.mulf %181, %181 : vector<8x32xf32>
    %cst_51 = arith.constant dense<0.000000e+00> : vector<8xf32>
    %183 = vector.multi_reduction <add>, %182, %cst_51 [1] : vector<8x32xf32> to vector<8xf32>
    %184 = vector.shape_cast %183 : vector<8xf32> to vector<8x1xf32>
    %cst_52 = arith.constant 3.200000e+01 : f32
    %185 = vector.broadcast %cst_52 : f32 to vector<8x1xf32>
    %186 = arith.divf %184, %185 : vector<8x1xf32>
    %187 = vector.broadcast %179 : vector<8x1xf32> to vector<8x32xf32>
    %188 = arith.subf %175, %187 : vector<8x32xf32>
    %cst_53 = arith.constant 9.99999996E-13 : f32
    %189 = vector.broadcast %cst_53 : f32 to vector<8x1xf32>
    %190 = arith.addf %186, %189 : vector<8x1xf32>
    %191 = math.rsqrt %190 : vector<8x1xf32>
    %192 = vector.broadcast %191 : vector<8x1xf32> to vector<8x32xf32>
    %193 = arith.mulf %188, %192 : vector<8x32xf32>
    %194 = vector.broadcast %11 : vector<1x32xf32> to vector<8x32xf32>
    %195 = arith.mulf %193, %194 : vector<8x32xf32>
    %196 = vector.broadcast %12 : vector<1x32xf32> to vector<8x32xf32>
    %197 = arith.addf %195, %196 : vector<8x32xf32>
    %c0_54 = arith.constant 0 : index
    %c0_55 = arith.constant 0 : index
    %198 = vector.load %arg10[%c0_54, %c0_55] : memref<8x32xf32, #tpu.memory_space<vmem>>, vector<8x32xf32>
    tpu.vector_store %arg10[%c0_54, %c0_55], %197 {strides = array<i32>} : memref<8x32xf32, #tpu.memory_space<vmem>>, vector<8x32xf32>,
    %c1_i32 = arith.constant 1 : i32
    %199 = arith.cmpi eq, %arg1, %c1_i32 : i32
    %200 = arith.extui %199 : i1 to i32
    %c0_i32_56 = arith.constant 0 : i32
    %201 = arith.cmpi ne, %200, %c0_i32_56 : i32
    scf.if %201 {
      %cst_57 = arith.constant 0.000000e+00 : f32
      %202 = vector.broadcast %cst_57 : f32 to vector<8x96xf32>
      %203 = tpu.concatenate %197, %202 in 1 : vector<8x32xf32>, vector<8x96xf32> -> vector<8x128xf32>
      %c0_58 = arith.constant 0 : index
      %c0_59 = arith.constant 0 : index
      %204 = vector.load %arg9[%c0_58, %c0_59] : memref<8x128xf32, #tpu.memory_space<vmem>>, vector<8x128xf32>
      tpu.vector_store %arg9[%c0_58, %c0_59], %203 {strides = array<i32>} : memref<8x128xf32, #tpu.memory_space<vmem>>, vector<8x128xf32>,
    } else {
    }
    return
  }
  func.func @transform_0(%arg0: i32, %arg1: i32) -> (i32, i32) {
    %c0_i32 = arith.constant 0 : i32
    %c0_i32_0 = arith.constant 0 : i32
    return %arg0, %c0_i32 : i32, i32
  }
  func.func @transform_1(%arg0: i32, %arg1: i32) -> (i32, i32) {
    %c0_i32 = arith.constant 0 : i32
    %c0_i32_0 = arith.constant 0 : i32
    %c0_i32_1 = arith.constant 0 : i32
    return %c0_i32, %c0_i32_0 : i32, i32
  }
  func.func @transform_2(%arg0: i32, %arg1: i32) -> (i32, i32, i32) {
    %c0_i32 = arith.constant 0 : i32
    %c0_i32_0 = arith.constant 0 : i32
    %c0_i32_1 = arith.constant 0 : i32
    return %arg1, %c0_i32, %c0_i32_0 : i32, i32, i32
  }
  func.func @transform_3(%arg0: i32, %arg1: i32) -> (i32, i32, i32) {
    %c0_i32 = arith.constant 0 : i32
    %c0_i32_0 = arith.constant 0 : i32
    %c0_i32_1 = arith.constant 0 : i32
    return %arg1, %c0_i32, %c0_i32_0 : i32, i32, i32
  }
  func.func @transform_4(%arg0: i32, %arg1: i32) -> (i32, i32, i32) {
    %c0_i32 = arith.constant 0 : i32
    %c0_i32_0 = arith.constant 0 : i32
    %c0_i32_1 = arith.constant 0 : i32
    return %arg1, %c0_i32, %c0_i32_0 : i32, i32, i32
  }
  func.func @transform_5(%arg0: i32, %arg1: i32) -> (i32, i32, i32) {
    %c0_i32 = arith.constant 0 : i32
    %c0_i32_0 = arith.constant 0 : i32
    %c0_i32_1 = arith.constant 0 : i32
    return %arg1, %c0_i32, %c0_i32_0 : i32, i32, i32
  }
  func.func @transform_6(%arg0: i32, %arg1: i32) -> (i32, i32, i32) {
    %c0_i32 = arith.constant 0 : i32
    %c0_i32_0 = arith.constant 0 : i32
    %c0_i32_1 = arith.constant 0 : i32
    return %arg1, %c0_i32, %c0_i32_0 : i32, i32, i32
  }
  func.func @transform_7(%arg0: i32, %arg1: i32) -> (i32, i32) {
    %c0_i32 = arith.constant 0 : i32
    %c0_i32_0 = arith.constant 0 : i32
    return %arg0, %c0_i32 : i32, i32
  }
}

</mosaic_0001>

<bundles_post_ra>
// kernel: tpu_custom_call.1
= control target key start
LH: loop header
LB: loop body
LE: loop exit
PB: predicated region body
PF: predicated region fallthrough
CT: control target
= control target key end

     0   :  { %s1952_s0 = inlined_call_operand.hbm [shape: f32[16,32], index: 0, kind: input, shape index: {}]   ;;  %s1953_s1 = inlined_call_operand.hbm [shape: f32[8,128], index: 1, kind: input, shape index: {}]   ;;  %s1954_s2 = inlined_call_operand.hbm [shape: f32[2,8,128], index: 2, kind: input, shape index: {}]   ;;  %s1955_s3 = inlined_call_operand.vmem [shape: bf16[2,32,96], index: 3, kind: input, shape index: {}]   ;;  %s1956_s4 = inlined_call_operand.vmem [shape: bf16[2,32,32], index: 4, kind: input, shape index: {}]   ;;  %s1957_s5 = inlined_call_operand.vmem [shape: bf16[2,32,64], index: 5, kind: input, shape index: {}]   ;;  %s1958_s6 = inlined_call_operand.vmem [shape: bf16[2,64,32], index: 6, kind: input, shape index: {}]   ;;  %s1959_s7 = inlined_call_operand.hbm [shape: f32[16,128], index: 7, kind: output, shape index: {}]  }
   0x1   :  { %1969 = sst [smem:[#allocation21_spill]] %s1952_s0 }
   0x2   :  { %1970 = sst [smem:[#allocation22_spill]] %s1953_s1 }
   0x3   :  { %1971 = sst [smem:[#allocation23_spill]] %s1954_s2 }
   0x4   :  { %1972 = sst [smem:[#allocation24_spill]] %s1955_s3 }
   0x5   :  { %1973 = sst [smem:[#allocation25_spill]] %s1956_s4 }
   0x6   :  { %1974 = sst [smem:[#allocation26_spill]] %s1957_s5 }
   0x7   :  { %1975 = sst [smem:[#allocation27_spill]] %s1958_s6 }
   0x8   :  { %1976 = sst [smem:[#allocation28_spill]] %s1959_s7 }
   0x9   :  { %12 = vsyncpa [#allocation4], 0 }
   0xa   :  { %14 = vsyncpa [#allocation4 + $0x1], 0 }
   0xb   :  { %15 = vsyncpa [#allocation7], 0 }
   0xc   :  { %16 = vsyncpa [#allocation5], 0 }
   0xd   :  { %18 = vsyncpa [#allocation5 + $0x1], 0  ;;  %s1588_s24 = smov 0   ;;  %s1590_s25 = smov 0  }
   0xe   :  { %s1592_s26 = smov 0   ;;  %s1594_s27 = smov 0  }
   0xf   :  { %s1596_s28 = smov 0   ;;  %s1598_s29 = smov 0  }
  0x10   :  { %s1600_s30 = smov 0   ;;  %s1602_s8 = smov 0  }
  0x11   :  { %s1604_s9 = smov 0   ;;  %s1606_s10 = smov 0  }
  0x12   :  { %s1608_s11 = smov 0  }
  0x13 LB: > { %1977 = sst [smem:[#allocation14_spill]] %s1511_s27  ;;  %s1070_s12 = sadd.s32 4294967294, %s1539_s11   ;;  %s1539_s11 = sphi %s1608_s11, %s24_s11   ;;  %s1535_s10 = sphi %s1606_s10, %s2018_s10   ;;  %s1531_s9 = sphi %s1604_s9, %s2017_s9   ;;  %s1527_s8 = sphi %s1602_s8, %s2007_s8   ;;  %s1523_s30 = sphi %s1600_s30, %s2016_s30   ;;  %s1519_s29 = sphi %s1598_s29, %s2015_s29   ;;  %s1515_s28 = sphi %s1596_s28, %s2014_s28   ;;  %s1511_s27 = sphi %s1594_s27, %s2013_s27   ;;  %s1507_s26 = sphi %s1592_s26, %s2012_s26   ;;  %s1503_s25 = sphi %s1590_s25, %s2011_s25   ;;  %s1499_s24 = sphi %s1588_s24, %s2010_s24  }
  0x14   : > { %1978 = sst [smem:[#allocation15_spill]] %s1527_s8  ;;  %p50_p0 = scmp.ne.s32.totalorder %s1519_s29, %s1515_s28 }
  0x15   : > { %1979 = sst [smem:[#allocation16_spill]] %s1535_s10  ;;  %p51_p1 = scmp.eq.s32.totalorder %s1539_s11, 0 }
  0x16   : > { %p56_p2 = scmp.ne.s32.totalorder %s1515_s28, %s1511_s27  ;;  %p237_p3 = scmp.eq.s32.totalorder %s1070_s12, 3 }
  0x17   : > { %p1656_p4 = por %p51_p1, %p50_p0  ;;  %p1189_p5 = scmp.lt.s32.totalorder %s1539_s11, 4 }
  0x18   : > { %p1664_p6 = por %p237_p3, %p56_p2  ;;  %s269_s17 = sand.u32 1, %s1539_s11  }
  0x19   : > { %s271_s18 = sand.u32 1, %s1519_s29   ;;  %s1075_s20 = sshll.u32 %s1535_s10, 3 }
  0x1a   : > { %s1981_s16 = scalar_select %p1664_p6, 1, 0 }
  0x1b   : > { %s1074_s19 = sshll.u32 %s271_s18, 3  ;;  %s1983_s0 = sld [smem:[#allocation21_spill]] }
  0x1c   : > { %1982 = sst [smem:[#allocation17_spill]] %s1981_s16  ;;  %s273_s14 = scalar_lea.vmem [#allocation3], %s1074_s19 }
  0x1d   : > { %s281_s13 = sshll.u32 %s273_s14, 4  ;;  %p1178_p7 = pnand %p1189_p5, %p1656_p4  ;;  %s282_s13 = int_to_ptr.vmem [resolvable:$true] %s281_s13 }
  0x1e   : > { %s1678_s16 = scalar_lea.sflag [#allocation4], %s269_s17  ;;  %s1682_s18 = sadd.s32 4294967295, %s1539_s11  }
  0x1f   : > { %p103_p8 = scmp.ne.s32.totalorder %s1503_s25, %s1499_s24  ;;  %p57_p9 = scmp.eq.s32.totalorder %s1682_s18, 0 }
  0x20   : > { %p231_p10 = scmp.eq.s32.totalorder %s1682_s18, 3  ;;  %p1071_p11 = scmp.ge.s32.totalorder %s1539_s11, 1 }
  0x21   : > { %s277_s23 = scalar_lea.hbm %s1983_s0, %s1075_s20  ;;  %p244_p12 = scmp.lt.s32.totalorder %s1539_s11, 5 }
  0x22   : > { %s279_s12 = sshll.u32 %s277_s23, 4  ;;  %p1695_p13 = por %p57_p9, %p56_p2  ;;  %s280_s12 = int_to_ptr.hbm [resolvable:$true] %s279_s12 }
  0x23   : > { %1180 = dma.hbm_to_vmem [thread:$0]  (!%p1178_p7), %s280_s12, 128, %s282_s13, %s1678_s16  }
  0x24   : > { %p1701_p3 = por %p103_p8, %p57_p9  ;;  %p1708_p4 = por %p231_p10, %p50_p0 }
  0x25   : > { %p1712_p7 = pnand %p1071_p11, %p244_p12  ;;  %s1989_s1 = sld [smem:[#allocation22_spill]] }
  0x26   : > { %s1986_s24 = scalar_select %p1708_p4, 1, 0 }
  0x27   : > { %p1173_p2 = pneg %p1712_p7  ;;  %s1541_s21 = smov [#allocation6]  }
  0x28   : > { %1987 = sst [smem:[#allocation18_spill]] %s1986_s24  ;;  %s258_s22 = sshll.u32 %s1541_s21, 4  ;;  %s259_s22 = int_to_ptr.vmem [resolvable:$true] %s258_s22 }
  0x29   : > { %p1174_p0 = pnand %p1173_p2, %p57_p9  ;;  %s33_s23 = sadd.s32 1, %s1531_s9 }
  0x2a   : > { %p34_p8 = scmp.ge.s32.totalorder %s33_s23, 2  ;;  %s90_s12 = sadd.s32 1, %s1507_s26 }
  0x2b   : > { %s256_s20 = sshll.u32 %s1989_s1, 4  ;;  %p97_p10 = scmp.ne.s32.totalorder %s1507_s26, %s1503_s25  ;;  %s257_s20 = int_to_ptr.hbm [resolvable:$true] %s256_s20 }
  0x2c   : > { %1176 = dma.hbm_to_vmem [thread:$0]  (!%p1174_p0), %s257_s20, 128, %s259_s22, [#allocation7]  }
  0x2d   : > { %s290_s17 = sand.u32 1, %s1507_s26   ;;  %s2020_s23 = smov (%p34_p8, %s33_s23), 0 }
  0x2e   : > { %1990 = sst [smem:[#allocation19_spill]] %s2020_s23  ;;  %s1991_s19 = sadd.s32 1, %s1535_s10 }
  0x2f   : > { %s2022_s19 = smov (!%p34_p8, %s1991_s19), %s1535_s10  ;;  %s87_s21 = ssub.s32 %s1531_s9, %s2020_s23 }
  0x30   : > { %p1737_p11 = por %p97_p10, %p51_p1  ;;  %p38_p12 = scmp.ge.s32.totalorder %s2022_s19, 2 }
  0x31   : > { %p88_p2 = scmp.eq.s32.totalorder %s87_s21, 0  ;;  %s1076_s20 = sshll.u32 %s290_s17, 3 }
  0x32   : > { %s1077_s22 = sshll.u32 %s1531_s9, 3  ;;  %s2024_s19 = smov (%p38_p12, %s2022_s19), 0 }
  0x33   : > { %1993 = sst [smem:[#allocation20_spill]] %s2024_s19  ;;  %s40_s27 = ssub.s32 %s1535_s10, %s2024_s19 }
  0x34   : > { %s1745_s1 = scalar_select %p88_p2, %s1507_s26, %s90_s12  }
  0x35   : > { %p41_p0 = scmp.eq.s32.totalorder %s40_s27, 0  ;;  %s1994_s2 = sld [smem:[#allocation23_spill]] }
  0x36   : > { %s292_s6 = scalar_lea.vmem [#allocation8], %s1076_s20  ;;  %s1995_s4 = sadd.s32 1, %s1519_s29 }
  0x37   : > { %s300_s5 = sshll.u32 %s292_s6, 4  ;;  %p1181_p1 = pnand %p1189_p5, %p1737_p11  ;;  %s301_s5 = int_to_ptr.vmem [resolvable:$true] %s300_s5 }
  0x38   : > { %s1755_s3 = scalar_select %p41_p0, %s1519_s29, %s1995_s4  }
  0x39   : > { %341 = sbr.rel (%p1712_p7) target bundleno = 2183 (0x887), region = 48  ;;  %s343_s7 = sand.u32 (!%p1712_p7), 1, %s1682_s18  }
  0x3a   : > { %s1966_s27 = sand.u32 (!%p1712_p7), 1, %s1515_s28   ;;  %s344_s4 = scalar_lea.sflag (!%p1712_p7), [#allocation4], %s343_s7 }
  0x3b   : > { %s296_s24 = scalar_lea.hbm %s1994_s2, %s1077_s22  ;;  %s1768_s6 = sshll.u32 (!%p1712_p7), %s1966_s27, 3 }
  0x3c   : > { %s298_s8 = sshll.u32 %s296_s24, 4  ;;  %s347_s24 = scalar_lea.vmem (!%p1712_p7), [#allocation3], %s1768_s6  ;;  %s299_s8 = int_to_ptr.hbm [resolvable:$true] %s298_s8 }
  0x3d   : > { %1183 = dma.hbm_to_vmem [thread:$0]  (!%p1181_p1), %s299_s8, 128, %s301_s5, %s1678_s16  }
  0x3e   : > { %1482 = dma.done.wait (%p1695_p13), %s344_s4, 128  }
  0x3f   : > { %1484 = vsyncadd (%p1695_p13), %s344_s4, 4294967168 }
  0x40   : > { %1486 = dma.done.wait (%p57_p9), [#allocation7], 128  }
  0x41   : > { %1488 = vsyncadd (%p57_p9), [#allocation7], 4294967168  ;;  %s360_s0 = sand.u32 1, %s1503_s25  }
  0x42   : > { %s1780_s5 = sshll.u32 %s360_s0, 3 }
  0x43   : > { %1490 = dma.done.wait (%p1701_p3), %s344_s4, 128  }
  0x44   : > { %1492 = vsyncadd (%p1701_p3), %s344_s4, 4294967168  ;;  %p419_p5 = scmp.lt.s32.totalorder %s1523_s30, 1  ;;  %s1996_s12 = sld [smem:[#allocation24_spill]] }
  0x45   : > { %s1997_s22 = sld [smem:[#allocation25_spill]]  ;;  %p1091_p9 = scmp.ne.s32.totalorder %s1523_s30, 0 }
  0x46   : > { %s420_s16 = scalar_select %p419_p5, %s1523_s30, 1 }
  0x47   : > { %s1998_s4 = sld [smem:[#allocation26_spill]] }
  0x48   : > { %s1149_s13 = sshll.u32 %s420_s16, 4  ;;  %s1152_s18 = sshll.u32 %s420_s16, 5 }
  0x49   : > { %s1999_s19 = sld [smem:[#allocation27_spill]]  ;;  %s418_s16 = scalar_lea.vmem [#allocation9], %s1768_s6 }
  0x4a   : > { %s1792_s17 = scalar_lea.vmem %s1996_s12, %s1149_s13 }
  0x4b   : > { %s1797_s7 = scalar_lea.vmem %s1997_s22, %s1149_s13  ;;  %443 = sbr.rel (%p1091_p9) target bundleno = 350 (0x15e), region = 64 }
  0x4d   : > { %s1802_s27 = scalar_lea.vmem %s1998_s4, %s1149_s13 }
  0x4f   : > { %s1807_s10 = scalar_lea.vmem %s1999_s19, %s1152_s18 }
  0x50   : > { %v446_v0 = vld [vmem:[%s347_s24] sm:$0xff]  ;;  %vm447_vm0 = vcmask 261120   ;;  %v1542_v2 = vmov 32.0   ;;  %v1287_v23 = vld [vmem:[#allocation6] ss:$0 sm:$0xff] }
  0x51   : > { %v448_v1 = vsel %vm447_vm0, %v446_v0, 0.0  ;;  %1289 = vrcp.f32 %v1542_v2  ;;  %v1288_v26 = vld [vmem:[#allocation6 + $0x1] ss:$0 sm:$0xff] }
  0x52   : > { %449 = vadd.xlane.f32.xlu0 %v448_v1 }
  0x57   : > { %v1290_v3 = vpop.eup %1289 }
  0x58   : > { %v452_v4 = vmul.f32 32.0, %v1290_v3  ;;  %vm456_vm1 = vweird.f32 %v1290_v3 }
  0x5a   : > { %v453_v5 = vsub.f32 1.0, %v452_v4 }
  0x5c   : > { %v454_v6 = vmul.f32 %v1290_v3, %v453_v5 }
  0x5e   : > { %v455_v7 = vadd.f32 %v1290_v3, %v454_v6 }
  0x60   : > { %v457_v8 = vsel %vm456_vm1, %v1290_v3, %v455_v7 }
  0xc5   : > { %v450_v9 = vpop.xlane.xlu0 %449 }
  0xc6   : > { %v458_v10 = vmul.f32 %v457_v8, %v450_v9 }
  0xc8   : > { %v459_v11 = vsub.f32 %v446_v0, %v458_v10 }
  0xca   : > { %v460_v12 = vmul.f32 %v459_v11, %v459_v11 }
  0xcc   : > { %v461_v13 = vsel %vm447_vm0, %v460_v12, 0.0 }
  0xcd   : > { %462 = vadd.xlane.f32.xlu0 %v461_v13 }
 0x140   : > { %v463_v14 = vpop.xlane.xlu0 %462 }
 0x141   : > { %v464_v15 = vmul.f32 %v463_v14, %v457_v8 }
 0x143   : > { %v465_v16 = vadd.f32 1e-12, %v464_v15 }
 0x145   : > { %1291 = vrsqrt.f32 %v465_v16  ;;  %vm472_vm3 = vweird.f32 %v465_v16 }
 0x14b   : > { %v1292_v17 = vpop.eup %1291 }
 0x14c   : > { %v467_v18 = vmul.f32 %v1292_v17, %v465_v16  ;;  %vm473_vm2 = vweird.f32 %v1292_v17 }
 0x14d   : > { %vm474_vm4 = vmor %vm472_vm3, %vm473_vm2 }
 0x14e   : > { %v468_v19 = vmul.f32 %v1292_v17, %v467_v18 }
 0x150   : > { %v469_v20 = vmul.f32 0.5, %v468_v19 }
 0x152   : > { %v470_v21 = vsub.f32 1.5, %v469_v20 }
 0x154   : > { %v471_v22 = vmul.f32 %v1292_v17, %v470_v21 }
 0x156   : > { %v475_v24 = vsel %vm474_vm4, %v1292_v17, %v471_v22 }
 0x157   : > { %v476_v25 = vmul.f32 %v475_v24, %v459_v11 }
 0x159   : > { %v478_v27 = vmul.f32 %v1287_v23, %v476_v25 }
 0x15b   : > { %v480_v28 = vadd.f32 %v1288_v26, %v478_v27 }
 0x15d   : > { %481 = vst.msk [vmem:[#allocation2] sm:$0xff] %vm447_vm0, %v480_v28 }
 0x15e PF: > { %v1154_v29 = vld [vmem:[%s1792_s17 + $0x8] sm:$0xff]  ;;  %v1153_v30 = vld [vmem:[%s1792_s17] sm:$0xff]  ;;  %vm524_vm5 = vcmask 261120   ;;  %s2000_s2 = scalar_lea.vmem [#allocation8], %s1780_s5  ;;  %s1543_s19 = smov 96   ;;  %v483_v39 = vlaneseq  ;;  %v1544_v42 = vmov 0.0  }
 0x15f   : > { %534 = vmatpush.bf16.msra.mxu0 %v1154_v29  ;;  %v1823_v33 = vld [vmem:[%s2000_s2] sm:$0xff]  ;;  %vm583_vm0 = vcmask 64512   ;;  %s1545_s24 = smov 64   ;;  %vm638_vm1 = vcmask 1043456   ;;  %p1144_p13 = scmp.ne.s32.totalorder %s1523_s30, 1 }
 0x160   : > { %v511_v34 = vperm.slane %v1823_v33, 0  ;;  %v484_v40 = vand.u32 127, %v483_v39 }
 0x162   : > { %vm490_vm6 = vcmp.ge.s32.totalorder %v484_v40, 8  ;;  %vm491_vm7 = vcmp.lt.s32.totalorder %v484_v40, 16  ;;  %vm486_vm8 = vcmp.lt.s32.totalorder %v484_v40, 8  ;;  %vm495_vm10 = vcmp.ge.s32.totalorder %v484_v40, 16 }
 0x163   : > { %535 = vmatpush.bf16.msra.mxu0 %v1153_v30  ;;  %vm492_vm9 = vmand %vm490_vm6, %vm491_vm7  ;;  %v1829_v43 = vsel %vm486_vm8, 1.0, %v1544_v42  ;;  %vm496_vm11 = vcmp.lt.s32.totalorder %v484_v40, 24  ;;  %vm500_vm12 = vcmp.ge.s32.totalorder %v484_v40, 24  ;;  %vm501_vm13 = vcmp.lt.s32.totalorder %v484_v40, 32  ;;  %v1156_v40 = vld [vmem:[%s1797_s7 + $0x8] sm:$0xff] }
 0x164   : > { %v1816_v31 = vld [vmem:[#allocation2] sm:$0xff]  ;;  %v1831_v44 = vsel %vm492_vm9, 1.0, %v1544_v42  ;;  %vm497_vm14 = vmand %vm495_vm10, %vm496_vm11  ;;  %695 = vmatpush.bf16.msra.mxu3 %v1156_v40 }
 0x165   : > { %v506_v32 = vpack.c.bf16 %v1816_v31, %v1816_v31  ;;  %vm502_vm15 = vmand %vm500_vm12, %vm501_vm13  ;;  %v1837_v49 = vsel %vm497_vm14, 1.0, %v1544_v42  ;;  %vm843_vm12 = vcmask 523264  }
 0x166   : > { %v1839_v50 = vsel %vm502_vm15, 1.0, %v1544_v42 }
 0x167   : > { %1104 = vmatmul.msk.bf16.vlgmr.msra.gmra.mxu0 %vm524_vm5, %v506_v32 }
 0x1e4   : > { %v537_v35 = vpop.f32.mrf.mxu0 }
 0x1e5   : > { %v538_v36 = vadd.f32 %v537_v35, %v511_v34 }
 0x1e7   : > { %v1826_v37 = vpack.c.bf16 %v538_v36, %v538_v36  ;;  %v541_v46 = vmul.f32 %v1829_v43, %v538_v36  ;;  %v542_v47 = vmul.f32 %v1831_v44, %v538_v36  ;;  %v543_v51 = vmul.f32 %v1837_v49, %v538_v36 }
 0x1e8   : > { %v544_v52 = vmul.f32 %v1839_v50, %v538_v36 }
 0x1e9   : > { %549 = vrot.lane.b32.xlu0 %v1826_v37, %s1543_s19  ;;  %v545_v48 = vpack.c.bf16 %v542_v47, %v541_v46 }
 0x1ea   : > { %v546_v53 = vpack.c.bf16 %v544_v52, %v543_v51 }
 0x1ec   : > { %v539_v38 = vpop.f32.mrf.mxu0 }
 0x25b   : > { %v550_v41 = vpop.permute.xlu0 %549 }
 0x25c   : > { %v558_v45 = vsel %vm524_vm5, %v550_v41, 0  ;;  %v1155_v41 = vld [vmem:[%s1797_s7] sm:$0xff] }
 0x25d   : > { %567 = vmatpush.bf16.xpose.msra.mxu1 %v558_v45  ;;  %696 = vmatpush.bf16.msra.mxu3 %v1155_v41 }
 0x264   : > { %1105 = vmatmul.msk.bf16.vlgmr.msra.gmra.mxu1 %vm524_vm5, %v545_v48 }
 0x274   : > { %1106 = vmatmul.msk.bf16.gmra.mxu1 %vm524_vm5, %v546_v53 }
 0x2e1   : > { %v569_v54 = vpop.f32.mrf.mxu1 }
 0x2e2   : > { %v579_v55 = vmul.f32 0.35355338, %v569_v54 }
 0x2e4   : > { %v584_v56 = vsel %vm583_vm0, %v579_v55, -inf }
 0x2e5   : > { %585 = vmax.xlane.f32.xlu0 %v584_v56 }
 0x2e9   : > { %v571_v57 = vpop.f32.mrf.mxu1 }
 0x2ea   : > { %v580_v58 = vmul.f32 0.35355338, %v571_v57 }
 0x2ec   : > { %v587_v59 = vsel %vm583_vm0, %v580_v58, -inf }
 0x2ed   : > { %588 = vmax.xlane.f32.xlu1 %v587_v59 }
 0x2f1   : > { %v574_v60 = vpop.f32.mrf.mxu1 }
 0x2f2   : > { %v581_v61 = vmul.f32 0.35355338, %v574_v60 }
 0x2f4   : > { %v590_v62 = vsel %vm583_vm0, %v581_v61, -inf }
 0x2f5   : > { %591 = vmax.xlane.f32.xlu1 %v590_v62 }
 0x2f9   : > { %v576_v63 = vpop.f32.mrf.mxu1 }
 0x2fa   : > { %v582_v0 = vmul.f32 0.35355338, %v576_v63 }
 0x2fc   : > { %v593_v1 = vsel %vm583_vm0, %v582_v0, -inf }
 0x2fd   : > { %594 = vmax.xlane.f32.xlu2 %v593_v1 }
 0x358   : > { %v586_v2 = vpop.xlane.xlu0 %585 }
 0x359   : > { %v596_v3 = vsub.f32 %v579_v55, %v586_v2 }
 0x35b   : > { %v600_v4 = vmul.f32 1.442695, %v596_v3 }
 0x35d   : > { %1293 = vpow2.f32 %v600_v4 }
 0x360   : > { %v589_v5 = vpop.xlane.xlu1 %588 }
 0x361   : > { %v597_v6 = vsub.f32 %v580_v58, %v589_v5  ;;  %v673_v58 = vperm.slane %v1823_v33, 1 }
 0x363   : > { %v1294_v7 = vpop.eup %1293  ;;  %v602_v8 = vmul.f32 1.442695, %v597_v6 }
 0x364   : > { %v608_v9 = vsel %vm583_vm0, %v1294_v7, 0.0 }
 0x365   : > { %1295 = vpow2.f32 %v602_v8  ;;  %609 = vadd.xlane.f32.xlu2 %v608_v9  ;;  %v1157_v8 = vld [vmem:[%s1802_s27] sm:$0xff] }
 0x368   : > { %v592_v10 = vpop.xlane.xlu1 %591 }
 0x369   : > { %v598_v11 = vsub.f32 %v581_v61, %v592_v10 }
 0x36b   : > { %v1296_v12 = vpop.eup %1295  ;;  %v604_v13 = vmul.f32 1.442695, %v598_v11 }
 0x36c   : > { %v611_v14 = vsel %vm583_vm0, %v1296_v12, 0.0 }
 0x36d   : > { %1297 = vpow2.f32 %v604_v13  ;;  %612 = vadd.xlane.f32.xlu1 %v611_v14 }
 0x370   : > { %v595_v15 = vpop.xlane.xlu2 %594 }
 0x371   : > { %v599_v16 = vsub.f32 %v582_v0, %v595_v15 }
 0x373   : > { %v1298_v17 = vpop.eup %1297  ;;  %v606_v18 = vmul.f32 1.442695, %v599_v16 }
 0x374   : > { %v614_v19 = vsel %vm583_vm0, %v1298_v17, 0.0 }
 0x375   : > { %1299 = vpow2.f32 %v606_v18  ;;  %615 = vadd.xlane.f32.xlu1 %v614_v19  ;;  %v732_v18 = vperm.slane %v1823_v33, 2 }
 0x37b   : > { %v1300_v20 = vpop.eup %1299 }
 0x37c   : > { %v617_v21 = vsel %vm583_vm0, %v1300_v20, 0.0 }
 0x37d   : > { %630 = vrot.lane.b32.xlu2 %v1826_v37, %s1545_s24  ;;  %618 = vadd.xlane.f32.xlu1 %v617_v21  ;;  %v734_v21 = vperm.slane %v1823_v33, 3 }
 0x3d8   : > { %v610_v22 = vpop.xlane.xlu2 %609 }
 0x3d9   : > { %1301 = vrcp.f32 %v610_v22 }
 0x3df   : > { %v1302_v26 = vpop.eup %1301 }
 0x3e0   : > { %v613_v23 = vpop.xlane.xlu1 %612  ;;  %v631_v24 = vpop.permute.xlu2 %630  ;;  %v624_v29 = vmul.f32 %v1302_v26, %v1294_v7  ;;  %v1158_v7 = vld [vmem:[%s1802_s27 + $0x8] sm:$0xff] }
 0x3e1   : > { %1303 = vrcp.f32 %v613_v23  ;;  %v640_v25 = vsel %vm638_vm1, %v631_v24, 0  ;;  %763 = vmatpush.bf16.msrb.mxu0 %v1158_v7  ;;  %v818_v7 = vperm.slane %v1823_v33, 5 }
 0x3e2   : > { %649 = vmatpush.bf16.msra.mxu2 %v640_v25  ;;  %v741_v25 = vperm.slane %v1823_v33, 4 }
 0x3e5   : > { %764 = vmatpush.bf16.msrb.mxu0 %v1157_v8 }
 0x3e7   : > { %v1304_v27 = vpop.eup %1303 }
 0x3e8   : > { %v616_v28 = vpop.xlane.xlu1 %615  ;;  %v625_v30 = vmul.f32 %v1304_v27, %v1296_v12 }
 0x3e9   : > { %1305 = vrcp.f32 %v616_v28 }
 0x3ea   : > { %v628_v32 = vpack.c.bf16 %v625_v30, %v624_v29 }
 0x3ec   : > { %1107 = vmatmul.msk.bf16.vlgmr.msra.gmra.mxu2 %vm583_vm0, %v628_v32 }
 0x3ef   : > { %v1306_v35 = vpop.eup %1305 }
 0x3f0   : > { %v619_v34 = vpop.xlane.xlu1 %618  ;;  %v626_v37 = vmul.f32 %v1306_v35, %v1298_v17  ;;  %v1162_v35 = vld [vmem:[%s1807_s10 + $0x18] sm:$0xff] }
 0x3f1   : > { %1307 = vrcp.f32 %v619_v34  ;;  %851 = vmatpush.bf16.msrb.mxu3 %v1162_v35 }
 0x3f7   : > { %v1308_v36 = vpop.eup %1307 }
 0x3f8   : > { %v627_v38 = vmul.f32 %v1308_v36, %v1300_v20  ;;  %v1161_v36 = vld [vmem:[%s1807_s10 + $0x10] sm:$0xff] }
 0x3f9   : > { %852 = vmatpush.bf16.msrb.mxu3 %v1161_v36 }
 0x3fa   : > { %v629_v39 = vpack.c.bf16 %v627_v38, %v626_v37 }
 0x3fc   : > { %1108 = vmatmul.msk.bf16.gmra.mxu2 %vm583_vm0, %v629_v39  ;;  %v1160_v39 = vld [vmem:[%s1807_s10 + $0x8] sm:$0xff] }
 0x3fd   : > { %853 = vmatpush.bf16.msrb.mxu3 %v1160_v39 }
 0x46f   : > { %v651_v42 = vpop.f32.mrf.mxu2 }
 0x470   : > { %v661_v48 = vmul.f32 %v1829_v43, %v651_v42 }
 0x477   : > { %v653_v45 = vpop.f32.mrf.mxu2 }
 0x478   : > { %v662_v47 = vmul.f32 %v1831_v44, %v653_v45 }
 0x47a   : > { %v663_v52 = vadd.f32 %v662_v47, %v661_v48 }
 0x47f   : > { %v656_v46 = vpop.f32.mrf.mxu2 }
 0x480   : > { %v664_v51 = vmul.f32 %v1837_v49, %v656_v46  ;;  %v1546_v49 = vmov 32.0   ;;  %v1159_v46 = vld [vmem:[%s1807_s10] sm:$0xff] }
 0x481   : > { %1309 = vrcp.f32 %v1546_v49  ;;  %854 = vmatpush.bf16.msrb.mxu3 %v1159_v46 }
 0x482   : > { %v665_v54 = vadd.f32 %v664_v51, %v663_v52 }
 0x487   : > { %v658_v53 = vpop.f32.mrf.mxu2  ;;  %v1310_v62 = vpop.eup %1309 }
 0x488   : > { %v666_v55 = vmul.f32 %v1839_v50, %v658_v53  ;;  %v707_v50 = vmul.f32 32.0, %v1310_v62  ;;  %vm711_vm2 = vweird.f32 %v1310_v62 }
 0x48a   : > { %v667_v56 = vadd.f32 %v666_v55, %v665_v54  ;;  %v708_v63 = vsub.f32 1.0, %v707_v50 }
 0x48c   : > { %v668_v57 = vpack.c.bf16 %v667_v56, %v667_v56  ;;  %v709_v0 = vmul.f32 %v1310_v62, %v708_v63 }
 0x48e   : > { %1117 = vmatmul.msk.bf16.vlgmr.msra.gmra.mxu3 %vm524_vm5, %v668_v57  ;;  %v710_v1 = vadd.f32 %v1310_v62, %v709_v0  ;;  %v1547_v0 = vmov -1.0  }
 0x490   : > { %v1865_v2 = vsel %vm711_vm2, %v1310_v62, %v710_v1 }
 0x511   : > { %v698_v59 = vpop.f32.mrf.mxu3 }
 0x512   : > { %v699_v60 = vadd.f32 %v698_v59, %v673_v58 }
 0x514   : > { %v702_v61 = vadd.f32 %v699_v60, %v1816_v31 }
 0x516   : > { %v703_v44 = vsel %vm524_vm5, %v702_v61, 0.0 }
 0x517   : > { %704 = vadd.xlane.f32.xlu1 %v703_v44 }
 0x519   : > { %v700_v43 = vpop.f32.mrf.mxu3 }
 0x58a   : > { %v705_v3 = vpop.xlane.xlu1 %704 }
 0x58b   : > { %v713_v4 = vmul.f32 %v1865_v2, %v705_v3 }
 0x58d   : > { %v714_v31 = vsub.f32 %v702_v61, %v713_v4 }
 0x58f   : > { %v715_v5 = vmul.f32 %v714_v31, %v714_v31 }
 0x591   : > { %v716_v6 = vsel %vm524_vm5, %v715_v5, 0.0 }
 0x592   : > { %717 = vadd.xlane.f32.xlu2 %v716_v6 }
 0x605   : > { %v718_v9 = vpop.xlane.xlu2 %717 }
 0x606   : > { %v719_v10 = vmul.f32 %v718_v9, %v1865_v2 }
 0x608   : > { %v720_v11 = vadd.f32 1e-12, %v719_v10 }
 0x60a   : > { %1311 = vrsqrt.f32 %v720_v11  ;;  %vm727_vm4 = vweird.f32 %v720_v11 }
 0x610   : > { %v1312_v12 = vpop.eup %1311 }
 0x611   : > { %v722_v13 = vmul.f32 %v1312_v12, %v720_v11  ;;  %vm728_vm3 = vweird.f32 %v1312_v12 }
 0x612   : > { %vm729_vm6 = vmor %vm727_vm4, %vm728_vm3 }
 0x613   : > { %v723_v14 = vmul.f32 %v1312_v12, %v722_v13 }
 0x615   : > { %v724_v15 = vmul.f32 0.5, %v723_v14 }
 0x617   : > { %v725_v16 = vsub.f32 1.5, %v724_v15 }
 0x619   : > { %v726_v17 = vmul.f32 %v1312_v12, %v725_v16 }
 0x61b   : > { %v730_v19 = vsel %vm729_vm6, %v1312_v12, %v726_v17 }
 0x61c   : > { %v731_v20 = vmul.f32 %v730_v19, %v714_v31 }
 0x61e   : > { %v733_v22 = vmul.f32 %v732_v18, %v731_v20 }
 0x620   : > { %v1874_v23 = vadd.f32 %v734_v21, %v733_v22 }
 0x622   : > { %v736_v24 = vpack.c.bf16 %v1874_v23, %v1874_v23 }
 0x624   : > { %1126 = vmatmul.msk.bf16.vlgmr.msrb.gmra.mxu0 %vm524_vm5, %v736_v24 }
 0x6a1   : > { %v766_v26 = vpop.f32.mrf.mxu0 }
 0x6a2   : > { %v767_v27 = vadd.f32 %v766_v26, %v741_v25 }
 0x6a4   : > { %v771_v28 = vmul.f32 0.70710677, %v767_v27  ;;  %v770_v4 = vmul.f32 0.5, %v767_v27  ;;  %v883_v27 = vperm.slane %v1823_v33, 6 }
 0x6a6   : > { %v774_v29 = vand.u32 2147483647, %v771_v28  ;;  %vm772_vm11 = vcmp.ge.f32.partialorder %v771_v28, 0.0 }
 0x6a7   : > { %v773_v1 = vsel %vm772_vm11, 1.0, %v1547_v0 }
 0x6a8   : > { %v775_v30 = vmul.f32 0.3275911, %v774_v29  ;;  %v800_v53 = vsub.f32 0.0, %v774_v29 }
 0x6a9   : > { %v768_v32 = vpop.f32.mrf.mxu0 }
 0x6aa   : > { %v776_v34 = vadd.f32 1.0, %v775_v30  ;;  %v801_v56 = vmul.f32 %v800_v53, %v774_v29  ;;  %v885_v29 = vperm.slane %v1823_v33, 7 }
 0x6ac   : > { %1313 = vrcp.f32 %v776_v34  ;;  %v788_v41 = vand.u32 2147483648, %v776_v34  ;;  %v786_v45 = vand.u32 2147483647, %v776_v34  ;;  %vm782_vm8 = vweird.f32 %v776_v34 }
 0x6ad   : > { %v802_v59 = vmul.f32 1.442695, %v801_v56 }
 0x6ae   : > { %v789_v48 = vor.u32 1.1754944e-38, %v788_v41  ;;  %vm787_vm10 = vcmp.eq.f32.partialorder %v786_v45, 8.507059e+37 }
 0x6af   : > { %1315 = vpow2.f32 %v802_v59 }
 0x6b2   : > { %v1314_v37 = vpop.eup %1313 }
 0x6b3   : > { %v778_v38 = vmul.f32 %v1314_v37, %v776_v34  ;;  %vm783_vm7 = vweird.f32 %v1314_v37 }
 0x6b4   : > { %vm784_vm9 = vmor %vm782_vm8, %vm783_vm7 }
 0x6b5   : > { %v779_v40 = vsub.f32 1.0, %v778_v38  ;;  %v1316_v62 = vpop.eup %1315 }
 0x6b7   : > { %v780_v42 = vmul.f32 %v1314_v37, %v779_v40 }
 0x6b9   : > { %v781_v47 = vadd.f32 %v1314_v37, %v780_v42 }
 0x6bb   : > { %v785_v51 = vsel %vm784_vm9, %v1314_v37, %v781_v47 }
 0x6bc   : > { %v790_v52 = vsel %vm787_vm10, %v789_v48, %v785_v51 }
 0x6bd   : > { %v791_v54 = vmul.f32 1.0614054, %v790_v52 }
 0x6bf   : > { %v792_v55 = vadd.f32 -1.4531521, %v791_v54 }
 0x6c1   : > { %v793_v57 = vmul.f32 %v792_v55, %v790_v52 }
 0x6c3   : > { %v794_v58 = vadd.f32 1.4214138, %v793_v57 }
 0x6c5   : > { %v795_v60 = vmul.f32 %v794_v58, %v790_v52 }
 0x6c7   : > { %v796_v61 = vadd.f32 -0.28449672, %v795_v60 }
 0x6c9   : > { %v797_v44 = vmul.f32 %v796_v61, %v790_v52 }
 0x6cb   : > { %v798_v43 = vadd.f32 0.2548296, %v797_v44 }
 0x6cd   : > { %v799_v49 = vmul.f32 %v798_v43, %v790_v52 }
 0x6cf   : > { %v804_v50 = vmul.f32 %v1316_v62, %v799_v49 }
 0x6d1   : > { %v805_v63 = vsub.f32 1.0, %v804_v50 }
 0x6d3   : > { %v806_v3 = vmul.f32 %v805_v63, %v773_v1 }
 0x6d5   : > { %v807_v31 = vadd.f32 1.0, %v806_v3 }
 0x6d7   : > { %v808_v5 = vmul.f32 %v807_v31, %v770_v4 }
 0x6d9   : > { %v809_v6 = vpack.c.bf16 %v808_v5, %v808_v5 }
 0x6db   : > { %1143 = vmatmul.msk.bf16.vlgmr.msrb.gmra.mxu3 %vm843_vm12, %v809_v6 }
 0x75e   : > { %v856_v8 = vpop.f32.mrf.mxu3 }
 0x75f   : > { %v857_v9 = vadd.f32 %v856_v8, %v818_v7 }
 0x761   : > { %v860_v10 = vadd.f32 %v857_v9, %v1874_v23 }
 0x763   : > { %v861_v11 = vsel %vm524_vm5, %v860_v10, 0.0 }
 0x764   : > { %862 = vadd.xlane.f32.xlu1 %v861_v11 }
 0x766   : > { %v858_v12 = vpop.f32.mrf.mxu3 }
 0x7d7   : > { %v863_v13 = vpop.xlane.xlu1 %862 }
 0x7d8   : > { %v864_v14 = vmul.f32 %v863_v13, %v1865_v2 }
 0x7da   : > { %v865_v15 = vsub.f32 %v860_v10, %v864_v14 }
 0x7dc   : > { %v866_v16 = vmul.f32 %v865_v15, %v865_v15 }
 0x7de   : > { %v867_v17 = vsel %vm524_vm5, %v866_v16, 0.0 }
 0x7df   : > { %868 = vadd.xlane.f32.xlu0 %v867_v17 }
 0x852   : > { %v869_v18 = vpop.xlane.xlu0 %868 }
 0x853   : > { %v870_v19 = vmul.f32 %v869_v18, %v1865_v2 }
 0x855   : > { %v871_v20 = vadd.f32 1e-12, %v870_v19 }
 0x857   : > { %1317 = vrsqrt.f32 %v871_v20  ;;  %vm878_vm14 = vweird.f32 %v871_v20 }
 0x85d   : > { %v1318_v21 = vpop.eup %1317 }
 0x85e   : > { %v873_v22 = vmul.f32 %v1318_v21, %v871_v20  ;;  %vm879_vm13 = vweird.f32 %v1318_v21 }
 0x85f   : > { %vm880_vm15 = vmor %vm878_vm14, %vm879_vm13 }
 0x860   : > { %v874_v23 = vmul.f32 %v1318_v21, %v873_v22 }
 0x862   : > { %v875_v24 = vmul.f32 0.5, %v874_v23 }
 0x864   : > { %v876_v25 = vsub.f32 1.5, %v875_v24 }
 0x866   : > { %v877_v26 = vmul.f32 %v1318_v21, %v876_v25 }
 0x868   : > { %v881_v28 = vsel %vm880_vm15, %v1318_v21, %v877_v26 }
 0x869   : > { %v882_v30 = vmul.f32 %v881_v28, %v865_v15 }
 0x86b   : > { %v884_v32 = vmul.f32 %v883_v27, %v882_v30  ;;  %891 = sbr.rel (%p1144_p13) target bundleno = 2162 (0x872), region = 68 }
 0x86d   : > { %v886_v34 = vadd.f32 %v885_v29, %v884_v32 }
 0x86f   : > { %887 = vst.msk [vmem:[#allocation2] sm:$0xff] %vm524_vm5, %v886_v34 }
 0x870   : > { %v892_v2 = vsel %vm524_vm5, %v886_v34, 0.0 }
 0x871   : > { %893 = vst [vmem:[%s418_s16] sm:$0xff] %v892_v2 }
 0x872 PF: > { %s2001_s10 = sld [smem:[#allocation15_spill]]  ;;  %s907_s23 = sshll.u32 %s418_s16, 4  ;;  %s908_s23 = int_to_ptr.vmem [resolvable:$true] %s907_s23 }
 0x873   : > { %s2003_s18 = sld [smem:[#allocation28_spill]]  ;;  %s2004_s12 = sand.u32 1, %s1515_s28  }
 0x874   : > { %s895_s17 = scalar_lea.sflag [#allocation5], %s2004_s12 }
 0x878   : > { %s1146_s5 = sshll.u32 %s2001_s10, 3 }
 0x879   : > { %s905_s15 = scalar_lea.hbm %s2003_s18, %s1146_s5  ;;  %s1429_s0 = scalar_lea.hbm %s2003_s18, 16 }
 0x87a   : > { %s909_s30 = sshll.u32 %s905_s15, 4  ;;  %s910_s30 = int_to_ptr.hbm [resolvable:$true] %s909_s30 }
 0x87b   : > { %s1423_s21 = sshra.s32 %s910_s30, 4  ;;  %s1424_s21 = int_to_ptr.hbm [resolvable:$true] %s1423_s21 }
 0x87c   : > { %s1425_s20 = scalar_lea.hbm %s1424_s21, 8  ;;  %p1430_p10 = scmp.lt.s32.totalorder %s1424_s21, %s2003_s18 }
 0x87d   : > { %p1426_p3 = scmp.ne.s32.totalorder %s1424_s21, %s1425_s20  ;;  %p1431_p11 = scmp.lt.s32.totalorder %s1429_s0, %s1425_s20 }
 0x87f   : > { %p1427_p7 = pnand %p1426_p3, %p1708_p4  ;;  %p1432_p12 = por %p1431_p11, %p1430_p10 }
 0x881   : > { %p1428_p8 = pneg %p1427_p7 }
 0x883   : > { %p1433_p2 = pnand %p1432_p12, %p1428_p8 }
 0x885   : > { %1436 = shalt.err (!%p1433_p2)
}
 0x886   : > { %1171 = dma.vmem_to_hbm [thread:$0]  (%p1708_p4), %s908_s23, 128, %s910_s30, %s895_s17  }
 0x887 PF: > { %s2005_s6 = sld [smem:[#allocation14_spill]]  ;;  %p1191_p0 = scmp.ge.s32.totalorder %s1539_s11, 2 }
 0x889   : > { %p1185_p1 = pnand %p1191_p0, %p1664_p6 }
 0x88b   : > { %p1186_p5 = pneg %p1185_p1 }
 0x88d   : > { %s921_s2 = sand.u32 1, %s2005_s6  }
 0x88e   : > { %s922_s19 = scalar_lea.sflag [#allocation5], %s921_s2 }
 0x88f   : > { %1494 = dma.done.wait (%p1186_p5), %s922_s19, 128  }
 0x890   : > { %1496 = vsyncadd (%p1186_p5), %s922_s19, 4294967168  ;;  %s24_s11 = sadd.s32 1, %s1539_s11   ;;  %s2007_s8 = sld [smem:[#allocation16_spill]] }
 0x891   : > { %p21_p9 = scmp.ge.s32.totalorder %s24_s11, 6   ;;  %s2008_s10 = sld [smem:[#allocation19_spill]] }
 0x892   : > { %s2009_s5 = sld [smem:[#allocation20_spill]]  ;;  %s2010_s24 = smov %s1503_s25 }
 0x893   : > { %s2011_s25 = smov %s1507_s26  ;;  %s2012_s26 = smov %s1745_s1 }
 0x894   : > { %s2013_s27 = smov %s1515_s28  ;;  %s2014_s28 = smov %s1519_s29 }
 0x895   : > { %s2015_s29 = smov %s1755_s3  ;;  %s2016_s30 = smov %s1531_s9 }
 0x896   :  { %23 = sbr.rel (!%p21_p9) target bundleno = 19 (0x13), region = 128 }
 0x897   : > { %s2017_s9 = smov %s2008_s10 }
 0x898   : > { %s2018_s10 = smov %s2009_s5 }
 0x89b   :  { %928 = vsyncpa [#allocation4], 1 }
 0x89c   :  { %930 = vsyncpa [#allocation4 + $0x1], 1 }
 0x89d   :  { %931 = vsyncpa [#allocation7], 1 }
 0x89e   :  { %932 = vsyncpa [#allocation5], 1 }
 0x89f   :  { %934 = vsyncpa [#allocation5 + $0x1], 1 }

</bundles_post_ra>
